<compile_context>
chip_gen: v6e
topology: v6e:2x2x1
jax: 0.10.0
libtpu: 0.0.40
codegen_flags: <defaults>
</compile_context>

<pallas_src>
import jax
import jax.numpy as jnp
import numpy as np
from jax.experimental import pallas as pl
from jax.experimental.pallas import tpu as pltpu


def _convlstm_kernel(w_ref, patches_ref, c_ref, h_out_ref, c_out_ref):
    """Fused ConvLSTM cell update (whole batch in one call).

    w_ref       : (4*hd, Kpad)   conv weights (+ folded bias column, zero pad)
    patches_ref : (Kpad, B*H*W)  im2col patches (+ ones row, zero pad)
    c_ref       : (hd,   B*H*W)  current cell state
    h_out_ref   : (hd,   B*H*W)
    c_out_ref   : (hd,   B*H*W)  (aliased with c_ref's HBM buffer)
    """
    hd = c_ref.shape[0]

    # Whole convolution (+ bias) as ONE MXU matmul with f32 accumulation:
    #   (4*hd, Kpad) @ (Kpad, B*H*W) -> (4*hd, B*H*W)
    acc = jnp.dot(w_ref[...], patches_ref[...],
                  preferred_element_type=jnp.float32)

    # Gate slabs: (hd, B*H*W) = (8, 512) sublane-aligned, lane-dense rows.
    i = jax.nn.sigmoid(acc[0 * hd:1 * hd])
    f = jax.nn.sigmoid(acc[1 * hd:2 * hd])
    o = jax.nn.sigmoid(acc[2 * hd:3 * hd])
    g = jnp.tanh(acc[3 * hd:4 * hd])

    c_cur = c_ref[...].astype(jnp.float32)
    c_next = f * c_cur + i * g
    h_next = o * jnp.tanh(c_next)

    # Unmasked full-lane stores (last dim = B*H*W = 512).
    h_out_ref[...] = h_next.astype(h_out_ref.dtype)
    c_out_ref[...] = c_next.astype(c_out_ref.dtype)


def convlstm_cell_forward(x_nchw, h_nchw, c_nchw, weight_oihw, bias4):
    """ConvLSTMCell.forward.  Inputs/outputs are NCHW (PyTorch convention).

    weight_oihw : (4*hidden, input_dim+hidden, KH, KW)  -- conv weight (OIHW).
    bias4       : (4,) per-gate scalar bias [i, f, o, g] (module's self.bias).
    """
    B, in_dim, H, W = x_nchw.shape
    hd = h_nchw.shape[1]
    cout, cin, KH, KW = weight_oihw.shape
    assert cin == in_dim + hd and cout == 4 * hd
    ph, pw = KH // 2, KW // 2
    HW = H * W
    BHW = B * HW
    K = KH * KW * cin                                   # 108
    Kpad = max(128, ((K + 1 + 127) // 128) * 128)       # bias row + pad -> 128

    # ---- im2col patches, channel-major, bias row folded, K padded to 128 ----
    comb = jnp.concatenate([x_nchw, h_nchw], axis=1)                 # (B,Cin,H,W)
    comb_p = jnp.pad(comb, ((0, 0), (0, 0), (ph, ph), (pw, pw)))     # "same" pad
    taps = [comb_p[:, :, kh:kh + H, kw:kw + W]
            for kh in range(KH) for kw in range(KW)]
    # (KHKW,B,Cin,H,W) -> (KHKW,Cin,B,H,W) -> (K, B*H*W); K = khkw*Cin + c,
    # lane index = b*H*W + h*W + w.
    patches = (jnp.stack(taps, axis=0)
               .transpose(0, 2, 1, 3, 4)
               .reshape(K, BHW))
    patches = jnp.concatenate(
        [patches,
         jnp.ones((1, BHW), patches.dtype),                          # bias row
         jnp.zeros((Kpad - K - 1, BHW), patches.dtype)], axis=0)     # zero pad

    # ---- weight matrix matching the patch K ordering, bias column folded ----
    # w_mat[o, khkw*Cin + c] = weight[o, c, kh, kw]
    w_mat = jnp.transpose(weight_oihw, (0, 2, 3, 1)).reshape(cout, K)
    bias_col = jnp.repeat(bias4.astype(w_mat.dtype), hd).reshape(cout, 1)
    w_mat = jnp.concatenate(
        [w_mat, bias_col, jnp.zeros((cout, Kpad - K - 1), w_mat.dtype)], axis=1)

    # Cell state with the same (b, h, w) lane ordering: (hd, B*H*W).
    c_flat = jnp.transpose(c_nchw, (1, 0, 2, 3)).reshape(hd, BHW)

    flops = 2 * cout * Kpad * BHW + 10 * hd * BHW
    transcendentals = 5 * hd * BHW
    bytes_accessed = 4 * (cout * Kpad + Kpad * BHW + 3 * hd * BHW)

    h_flat, c_next_flat = pl.pallas_call(
        _convlstm_kernel,
        out_shape=(jax.ShapeDtypeStruct((hd, BHW), x_nchw.dtype),
                   jax.ShapeDtypeStruct((hd, BHW), x_nchw.dtype)),
        grid=(1,),
        in_specs=[
            pl.BlockSpec((cout, Kpad), lambda i: (0, 0)),   # weights (+bias col)
            pl.BlockSpec((Kpad, BHW), lambda i: (0, 0)),    # im2col patches
            pl.BlockSpec((hd, BHW), lambda i: (0, 0)),      # cell state
        ],
        out_specs=(
            pl.BlockSpec((hd, BHW), lambda i: (0, 0)),      # h_next
            pl.BlockSpec((hd, BHW), lambda i: (0, 0)),      # c_next
        ),
        input_output_aliases={2: 1},                        # c_in -> c_next
        compiler_params=pltpu.CompilerParams(
            dimension_semantics=("arbitrary",),
            allow_input_fusion=[False, True, False]),
        cost_estimate=pl.CostEstimate(
            flops=flops, transcendentals=transcendentals,
            bytes_accessed=bytes_accessed),
    )(w_mat, patches, c_flat)

    # Back to NCHW (cheap channel<->batch transpose of ~16 KB per tensor).
    h_next = jnp.transpose(h_flat.reshape(hd, B, H, W), (1, 0, 2, 3))
    c_next = jnp.transpose(c_next_flat.reshape(hd, B, H, W), (1, 0, 2, 3))
    return h_next, c_next


def _reference_forward(x_nchw, h_nchw, c_nchw, weight_oihw, bias4):
    """Pure-JAX reference matching the PyTorch module semantics."""
    hd = h_nchw.shape[1]
    comb = jnp.concatenate([x_nchw, h_nchw], axis=1)                 # NCHW
    out = jax.lax.conv_general_dilated(
        comb, weight_oihw, window_strides=(1, 1), padding="SAME",
        dimension_numbers=("NCHW", "OIHW", "NCHW"))
    cc_i, cc_f, cc_o, cc_g = jnp.split(out, 4, axis=1)
    i = jax.nn.sigmoid(cc_i + bias4[0])
    f = jax.nn.sigmoid(cc_f + bias4[1])
    o = jax.nn.sigmoid(cc_o + bias4[2])
    g = jnp.tanh(cc_g + bias4[3])
    c_next = f * c_nchw + i * g
    h_next = o * jnp.tanh(c_next)
    return h_next, c_next


if __name__ == "__main__":
    # Module config: input_size=(16,16), input_dim=4, hidden_dim=8,
    # kernel_size=(3,3), bias=True (module bias tensor = [1,1,1,0]).
    B, IN_DIM, HID, H, W = 2, 4, 8, 16, 16
    KH, KW = 3, 3
    CIN = IN_DIM + HID

    key = jax.random.PRNGKey(0)
    k_x, k_h, k_c, k_w = jax.random.split(key, 4)

    x = jax.random.normal(k_x, (B, IN_DIM, H, W), jnp.float32)
    # init_hidden gives zeros; use random h/c to exercise the full update path.
    h0 = jax.random.normal(k_h, (B, HID, H, W), jnp.float32)
    c0 = jax.random.normal(k_c, (B, HID, H, W), jnp.float32)

    # conv.weight.data.normal_(0, 0.01); PyTorch OIHW layout, conv bias=False.
    weight = 0.01 * jax.random.normal(k_w, (4 * HID, CIN, KH, KW), jnp.float32)
    bias4 = jnp.array([1.0, 1.0, 1.0, 0.0], jnp.float32)

    h_next, c_next = jax.jit(convlstm_cell_forward)(x, h0, c0, weight, bias4)
    jax.block_until_ready((h_next, c_next))

    h_ref, c_ref = _reference_forward(x, h0, c0, weight, bias4)
    np.testing.assert_allclose(np.asarray(h_next), np.asarray(h_ref),
                               rtol=1e-4, atol=1e-4)
    np.testing.assert_allclose(np.asarray(c_next), np.asarray(c_ref),
                               rtol=1e-4, atol=1e-4)

    print("KERNEL_OK")
</pallas_src>

<mosaic_0001>
module attributes {stable_mosaic.version = 11 : i64} {
  func.func @_convlstm_kernel(%arg0: i32, %arg1: memref<32x128xf32, #tpu.memory_space<vmem>>, %arg2: memref<128x512xf32, #tpu.memory_space<vmem>>, %arg3: memref<8x512xf32, #tpu.memory_space<vmem>>, %arg4: memref<8x512xf32, #tpu.memory_space<vmem>>, %arg5: memref<8x512xf32, #tpu.memory_space<vmem>>) attributes {dimension_semantics = [#tpu.dimension_semantics<arbitrary>], iteration_bounds = array<i64: 1>, scalar_prefetch = 0 : i64, scratch_operands = 0 : i64, tpu.core_type = #tpu.core_type<tc>, window_params = [{pipeline_mode = #tpu.pipeline_mode<synchronous>, transform_indices = @transform_0, window_bounds = array<i64: 32, 128>}, {pipeline_mode = #tpu.pipeline_mode<synchronous>, transform_indices = @transform_1, window_bounds = array<i64: 128, 512>}, {pipeline_mode = #tpu.pipeline_mode<synchronous>, transform_indices = @transform_2, window_bounds = array<i64: 8, 512>}, {pipeline_mode = #tpu.pipeline_mode<synchronous>, transform_indices = @transform_3, window_bounds = array<i64: 8, 512>}, {pipeline_mode = #tpu.pipeline_mode<synchronous>, transform_indices = @transform_4, window_bounds = array<i64: 8, 512>}]} {
    %c0 = arith.constant 0 : index
    %c0_0 = arith.constant 0 : index
    %0 = vector.load %arg1[%c0, %c0_0] : memref<32x128xf32, #tpu.memory_space<vmem>>, vector<32x128xf32>
    %c0_1 = arith.constant 0 : index
    %c0_2 = arith.constant 0 : index
    %1 = vector.load %arg2[%c0_1, %c0_2] : memref<128x512xf32, #tpu.memory_space<vmem>>, vector<128x512xf32>
    %cst = arith.constant dense<0.000000e+00> : vector<32x512xf32>
    %2 = tpu.matmul %0, %1, %cst {dimension_numbers = #tpu.dot_dimension_numbers<[1], [0], [0], [1], [0, 0, 1, 1], [], []>} : vector<32x128xf32>, vector<128x512xf32>, vector<32x512xf32> -> vector<32x512xf32>
    %3 = vector.extract_strided_slice %2 {offsets = [0, 0], sizes = [8, 512], strides = [1, 1]} : vector<32x512xf32> to vector<8x512xf32>
    %4 = arith.negf %3 : vector<8x512xf32>
    %5 = math.exp %4 : vector<8x512xf32>
    %cst_3 = arith.constant 1.000000e+00 : f32
    %6 = vector.broadcast %cst_3 : f32 to vector<8x512xf32>
    %7 = arith.addf %6, %5 : vector<8x512xf32>
    %8 = arith.divf %6, %7 : vector<8x512xf32>
    %9 = vector.extract_strided_slice %2 {offsets = [8, 0], sizes = [8, 512], strides = [1, 1]} : vector<32x512xf32> to vector<8x512xf32>
    %10 = arith.negf %9 : vector<8x512xf32>
    %11 = math.exp %10 : vector<8x512xf32>
    %cst_4 = arith.constant 1.000000e+00 : f32
    %12 = vector.broadcast %cst_4 : f32 to vector<8x512xf32>
    %13 = arith.addf %12, %11 : vector<8x512xf32>
    %14 = arith.divf %12, %13 : vector<8x512xf32>
    %15 = vector.extract_strided_slice %2 {offsets = [16, 0], sizes = [8, 512], strides = [1, 1]} : vector<32x512xf32> to vector<8x512xf32>
    %16 = arith.negf %15 : vector<8x512xf32>
    %17 = math.exp %16 : vector<8x512xf32>
    %cst_5 = arith.constant 1.000000e+00 : f32
    %18 = vector.broadcast %cst_5 : f32 to vector<8x512xf32>
    %19 = arith.addf %18, %17 : vector<8x512xf32>
    %20 = arith.divf %18, %19 : vector<8x512xf32>
    %21 = vector.extract_strided_slice %2 {offsets = [24, 0], sizes = [8, 512], strides = [1, 1]} : vector<32x512xf32> to vector<8x512xf32>
    %22 = math.tanh %21 : vector<8x512xf32>
    %c0_6 = arith.constant 0 : index
    %c0_7 = arith.constant 0 : index
    %23 = vector.load %arg3[%c0_6, %c0_7] : memref<8x512xf32, #tpu.memory_space<vmem>>, vector<8x512xf32>
    %24 = arith.mulf %14, %23 : vector<8x512xf32>
    %25 = arith.mulf %8, %22 : vector<8x512xf32>
    %26 = arith.addf %24, %25 : vector<8x512xf32>
    %27 = math.tanh %26 : vector<8x512xf32>
    %28 = arith.mulf %20, %27 : vector<8x512xf32>
    %c0_8 = arith.constant 0 : index
    %c0_9 = arith.constant 0 : index
    %29 = vector.load %arg4[%c0_8, %c0_9] : memref<8x512xf32, #tpu.memory_space<vmem>>, vector<8x512xf32>
    tpu.vector_store %arg4[%c0_8, %c0_9], %28 {strides = array<i32>} : memref<8x512xf32, #tpu.memory_space<vmem>>, vector<8x512xf32>,
    %c0_10 = arith.constant 0 : index
    %c0_11 = arith.constant 0 : index
    %30 = vector.load %arg5[%c0_10, %c0_11] : memref<8x512xf32, #tpu.memory_space<vmem>>, vector<8x512xf32>
    tpu.vector_store %arg5[%c0_10, %c0_11], %26 {strides = array<i32>} : memref<8x512xf32, #tpu.memory_space<vmem>>, vector<8x512xf32>,
    return
  }
  func.func @transform_0(%arg0: i32) -> (i32, i32) {
    %c0_i32 = arith.constant 0 : i32
    %c0_i32_0 = arith.constant 0 : i32
    %c0_i32_1 = arith.constant 0 : i32
    return %c0_i32, %c0_i32_0 : i32, i32
  }
  func.func @transform_1(%arg0: i32) -> (i32, i32) {
    %c0_i32 = arith.constant 0 : i32
    %c0_i32_0 = arith.constant 0 : i32
    %c0_i32_1 = arith.constant 0 : i32
    return %c0_i32, %c0_i32_0 : i32, i32
  }
  func.func @transform_2(%arg0: i32) -> (i32, i32) {
    %c0_i32 = arith.constant 0 : i32
    %c0_i32_0 = arith.constant 0 : i32
    %c0_i32_1 = arith.constant 0 : i32
    return %c0_i32, %c0_i32_0 : i32, i32
  }
  func.func @transform_3(%arg0: i32) -> (i32, i32) {
    %c0_i32 = arith.constant 0 : i32
    %c0_i32_0 = arith.constant 0 : i32
    %c0_i32_1 = arith.constant 0 : i32
    return %c0_i32, %c0_i32_0 : i32, i32
  }
  func.func @transform_4(%arg0: i32) -> (i32, i32) {
    %c0_i32 = arith.constant 0 : i32
    %c0_i32_0 = arith.constant 0 : i32
    %c0_i32_1 = arith.constant 0 : i32
    return %c0_i32, %c0_i32_0 : i32, i32
  }
}

</mosaic_0001>

<bundles_post_ra>
// kernel: convlstm_cell_forward.2
= control target key start
LH: loop header
LB: loop body
LE: loop exit
PB: predicated region body
PF: predicated region fallthrough
CT: control target
= control target key end

     0   :  { %v1834_v3 = vmov 0.0   ;;  %v1140_v4 = vlaneseq  ;;  %s2116_s0 = inlined_call_operand.vmem [shape: f32[32,128], index: 0, kind: input, shape index: {}]   ;;  %s2117_s1 = inlined_call_operand.vmem [shape: f32[8,512], index: 1, kind: input, shape index: {}, may-alias: {1,7}]   ;;  %s2118_s2 = inlined_call_operand.vmem [shape: f32[108,512], index: 2, kind: input, shape index: {}]   ;;  %s2119_s3 = inlined_call_operand.<no memory space> [shape: f32[], index: 3, kind: input, shape index: {}]   ;;  %s2120_s4 = inlined_call_operand.vmem [shape: f32[128], index: 4, kind: input, shape index: {}]   ;;  %s2121_s5 = inlined_call_operand.vmem [shape: f32[128], index: 5, kind: input, shape index: {}]   ;;  %s2122_s6 = inlined_call_operand.vmem [shape: f32[8,512], index: 6, kind: output, shape index: {0}]   ;;  %s2123_s7 = inlined_call_operand.vmem [shape: f32[8,512], index: 7, kind: output, shape index: {1}, may-alias: {1,7}]  }
   0x1   :  { %v1878_v0 = vstv %s2119_s3  ;;  %v1287_v1 = vld [vmem:[%s2121_s5] ss:$0 sm:$0xff]  ;;  %1472 = vmatprep.mubr.f32.mxu0 %v1834_v3  ;;  %1561 = vmatprep.mubr.f32.mxu1 %v1834_v3  ;;  %v1754_v14 = vld [vmem:[%s2118_s2 + $0x1a8] sm:$0xff]  ;;  %v1755_v15 = vld [vmem:[%s2118_s2 + $0x1b0] sm:$0xff] }
   0x2   :  { %v1282_v2 = vld [vmem:[%s2120_s4] ss:$0 sm:$0xff]  ;;  %1290 = vbcast.lane.b32.xlu0 %v1287_v1, 376  ;;  %v1141_v5 = vshrl.u32 %v1140_v4, 7  ;;  %v1756_v16 = vld [vmem:[%s2118_s2 + $0x1b8] sm:$0xff]  ;;  %v1750_v31 = vld [vmem:[%s2118_s2 + $0x188] sm:$0xff] }
   0x3   :  { %1285 = vbcast.lane.b32.xlu1 %v1282_v2, 376  ;;  %v1753_v13 = vld [vmem:[%s2118_s2 + $0x1a0] sm:$0xff]  ;;  %v1752_v32 = vld [vmem:[%s2118_s2 + $0x198] sm:$0xff]  ;;  %v1751_v34 = vld [vmem:[%s2118_s2 + $0x190] sm:$0xff] }
   0x4   :  { %v1142_v9 = vadd.s32 104, %v1141_v5  ;;  %v1749_v33 = vld [vmem:[%s2118_s2 + $0x180] sm:$0xff]  ;;  %v1746_v45 = vld [vmem:[%s2118_s2 + $0x168] sm:$0xff]  ;;  %v1748_v46 = vld [vmem:[%s2118_s2 + $0x178] sm:$0xff] }
   0x5   :  { %v1745_v47 = vld [vmem:[%s2118_s2 + $0x160] sm:$0xff]  ;;  %v1747_v48 = vld [vmem:[%s2118_s2 + $0x170] sm:$0xff]  ;;  %v1742_v59 = vld [vmem:[%s2118_s2 + $0x148] sm:$0xff] }
   0x6   :  { %1232 = vbcast.lane.b32.xlu0 %v1287_v1, 368  ;;  %vm1143_vm0 = vcmp.lt.s32.totalorder %v1142_v9, 108  ;;  %v1744_v60 = vld [vmem:[%s2118_s2 + $0x158] sm:$0xff]  ;;  %v1741_v61 = vld [vmem:[%s2118_s2 + $0x140] sm:$0xff]  ;;  %v1743_v62 = vld [vmem:[%s2118_s2 + $0x150] sm:$0xff] }
   0x7   :  { %1153 = vbcast.lane.b32.xlu1 %v1287_v1, 360  ;;  %v1144_v18 = vsel %vm1143_vm0, %v1753_v13, %v1878_v0  ;;  %v1173_v21 = vsel %vm1143_vm0, %v1754_v14, %v1878_v0  ;;  %v1192_v22 = vsel %vm1143_vm0, %v1755_v15, %v1878_v0  ;;  %v1211_v23 = vsel %vm1143_vm0, %v1756_v16, %v1878_v0  ;;  %v1739_v13 = vld [vmem:[%s2118_s2 + $0x130] sm:$0xff] }
   0xa   :  { %1227 = vbcast.lane.b32.xlu0 %v1282_v2, 368 }
   0xb   :  { %1067 = vbcast.lane.b32.xlu1 %v1287_v1, 352 }
   0xe   :  { %1148 = vbcast.lane.b32.xlu0 %v1282_v2, 360 }
   0xf   :  { %981 = vbcast.lane.b32.xlu1 %v1287_v1, 344 }
  0x12   :  { %1062 = vbcast.lane.b32.xlu0 %v1282_v2, 352 }
  0x13   :  { %895 = vbcast.lane.b32.xlu1 %v1287_v1, 336 }
  0x16   :  { %976 = vbcast.lane.b32.xlu0 %v1282_v2, 344 }
  0x17   :  { %809 = vbcast.lane.b32.xlu1 %v1287_v1, 328 }
  0x1a   :  { %890 = vbcast.lane.b32.xlu0 %v1282_v2, 336 }
  0x1b   :  { %723 = vbcast.lane.b32.xlu1 %v1287_v1, 320 }
  0x1e   :  { %804 = vbcast.lane.b32.xlu0 %v1282_v2, 328 }
  0x1f   :  { %637 = vbcast.lane.b32.xlu1 %v1287_v1, 312 }
  0x22   :  { %718 = vbcast.lane.b32.xlu0 %v1282_v2, 320 }
  0x23   :  { %551 = vbcast.lane.b32.xlu1 %v1287_v1, 304 }
  0x26   :  { %632 = vbcast.lane.b32.xlu0 %v1282_v2, 312 }
  0x27   :  { %465 = vbcast.lane.b32.xlu1 %v1287_v1, 296 }
  0x2a   :  { %546 = vbcast.lane.b32.xlu0 %v1282_v2, 304 }
  0x2b   :  { %379 = vbcast.lane.b32.xlu1 %v1287_v1, 288 }
  0x2e   :  { %460 = vbcast.lane.b32.xlu0 %v1282_v2, 296 }
  0x2f   :  { %293 = vbcast.lane.b32.xlu1 %v1287_v1, 280 }
  0x32   :  { %374 = vbcast.lane.b32.xlu0 %v1282_v2, 288 }
  0x33   :  { %207 = vbcast.lane.b32.xlu1 %v1287_v1, 272 }
  0x36   :  { %288 = vbcast.lane.b32.xlu0 %v1282_v2, 280 }
  0x37   :  { %121 = vbcast.lane.b32.xlu1 %v1287_v1, 264 }
  0x3a   :  { %202 = vbcast.lane.b32.xlu0 %v1282_v2, 272 }
  0x3b   :  { %36 = vbcast.lane.b32.xlu1 %v1287_v1, 256 }
  0x3e   :  { %116 = vbcast.lane.b32.xlu0 %v1282_v2, 264 }
  0x3f   :  { %32 = vbcast.lane.b32.xlu1 %v1282_v2, 256 }
  0x74   :  { %v1291_v6 = vpop.permute.xlu0 %1290 }
  0x75   :  { %v1286_v7 = vpop.permute.xlu1 %1285  ;;  %v1294_v8 = vmax.f32 %v1878_v0, %v1291_v6 }
  0x77   :  { %v1298_v10 = vmax.f32 %v1294_v8, %v1286_v7 }
  0x78   :  { %v1233_v11 = vpop.permute.xlu0 %1232 }
  0x79   :  { %v1154_v12 = vpop.permute.xlu1 %1153  ;;  %1408 = vmatprep.subr.mxu0 %v1298_v10  ;;  %1497 = vmatprep.subr.mxu1 %v1298_v10  ;;  %v1236_v17 = vmax.f32 %v1878_v0, %v1233_v11  ;;  %v1740_v11 = vld [vmem:[%s2118_s2 + $0x138] sm:$0xff] }
  0x7a   :  { %1409 = vmatpush1.msra.mxu0 %v1298_v10  ;;  %1498 = vmatpush1.msra.mxu1 %v1298_v10  ;;  %v1157_v25 = vmax.f32 %v1144_v18, %v1154_v12  ;;  %v1176_v26 = vmax.f32 %v1173_v21, %v1154_v12  ;;  %v1195_v27 = vmax.f32 %v1192_v22, %v1154_v12  ;;  %v1738_v10 = vld [vmem:[%s2118_s2 + $0x128] sm:$0xff] }
  0x7b   :  { %v1214_v28 = vmax.f32 %v1211_v23, %v1154_v12  ;;  %v1737_v12 = vld [vmem:[%s2118_s2 + $0x120] sm:$0xff] }
  0x7c   :  { %v1228_v19 = vpop.permute.xlu0 %1227 }
  0x7d   :  { %v1068_v20 = vpop.permute.xlu1 %1067  ;;  %v1240_v24 = vmax.f32 %v1236_v17, %v1228_v19 }
  0x7e   :  { %v1071_v39 = vmax.f32 %v1749_v33, %v1068_v20  ;;  %v1090_v40 = vmax.f32 %v1750_v31, %v1068_v20  ;;  %v1128_v41 = vmax.f32 %v1752_v32, %v1068_v20  ;;  %v1109_v44 = vmax.f32 %v1751_v34, %v1068_v20 }
  0x7f   :  { %1410 = vmatprep.subr.mxu0 %v1240_v24  ;;  %1499 = vmatprep.subr.mxu1 %v1240_v24 }
  0x80   :  { %1411 = vmatpush1.msra.mxu0 %v1240_v24  ;;  %1500 = vmatpush1.msra.mxu1 %v1240_v24  ;;  %v1149_v29 = vpop.permute.xlu0 %1148  ;;  %v1734_v24 = vld [vmem:[%s2118_s2 + $0x108] sm:$0xff] }
  0x81   :  { %v982_v30 = vpop.permute.xlu1 %981  ;;  %v1180_v35 = vmax.f32 %v1176_v26, %v1149_v29  ;;  %v1218_v36 = vmax.f32 %v1214_v28, %v1149_v29  ;;  %v1161_v37 = vmax.f32 %v1157_v25, %v1149_v29  ;;  %v1199_v38 = vmax.f32 %v1195_v27, %v1149_v29  ;;  %v1736_v25 = vld [vmem:[%s2118_s2 + $0x118] sm:$0xff]  ;;  %v1733_v26 = vld [vmem:[%s2118_s2 + $0x100] sm:$0xff]  ;;  %v1735_v27 = vld [vmem:[%s2118_s2 + $0x110] sm:$0xff] }
  0x82   :  { %v985_v53 = vmax.f32 %v1745_v47, %v982_v30  ;;  %v1004_v54 = vmax.f32 %v1746_v45, %v982_v30  ;;  %v1042_v55 = vmax.f32 %v1748_v46, %v982_v30  ;;  %v1023_v58 = vmax.f32 %v1747_v48, %v982_v30 }
  0x83   :  { %1412 = vmatprep.subr.mxu0 %v1180_v35  ;;  %1501 = vmatprep.subr.mxu1 %v1218_v36 }
  0x84   :  { %v1063_v42 = vpop.permute.xlu0 %1062  ;;  %1413 = vmatpush1.msra.mxu0 %v1161_v37  ;;  %1502 = vmatpush1.msra.mxu1 %v1199_v38  ;;  %v1730_v38 = vld [vmem:[%s2118_s2 + $0xe8] sm:$0xff] }
  0x85   :  { %v896_v43 = vpop.permute.xlu1 %895  ;;  %v1094_v49 = vmax.f32 %v1090_v40, %v1063_v42  ;;  %v1132_v50 = vmax.f32 %v1128_v41, %v1063_v42  ;;  %v1075_v51 = vmax.f32 %v1071_v39, %v1063_v42  ;;  %v1113_v52 = vmax.f32 %v1109_v44, %v1063_v42  ;;  %v1732_v39 = vld [vmem:[%s2118_s2 + $0xf8] sm:$0xff]  ;;  %v1729_v40 = vld [vmem:[%s2118_s2 + $0xe0] sm:$0xff]  ;;  %v1731_v41 = vld [vmem:[%s2118_s2 + $0xf0] sm:$0xff] }
  0x86   :  { %v899_v4 = vmax.f32 %v1741_v61, %v896_v43  ;;  %v918_v5 = vmax.f32 %v1742_v59, %v896_v43  ;;  %v956_v6 = vmax.f32 %v1744_v60, %v896_v43  ;;  %v937_v9 = vmax.f32 %v1743_v62, %v896_v43 }
  0x87   :  { %1414 = vmatprep.subr.mxu0 %v1094_v49  ;;  %1503 = vmatprep.subr.mxu1 %v1132_v50 }
  0x88   :  { %v977_v56 = vpop.permute.xlu0 %976  ;;  %1415 = vmatpush1.msra.mxu0 %v1075_v51  ;;  %1504 = vmatpush1.msra.mxu1 %v1113_v52  ;;  %v1726_v52 = vld [vmem:[%s2118_s2 + $0xc8] sm:$0xff] }
  0x89   :  { %v810_v57 = vpop.permute.xlu1 %809  ;;  %v1008_v63 = vmax.f32 %v1004_v54, %v977_v56  ;;  %v1046_v0 = vmax.f32 %v1042_v55, %v977_v56  ;;  %v989_v1 = vmax.f32 %v985_v53, %v977_v56  ;;  %v1027_v2 = vmax.f32 %v1023_v58, %v977_v56  ;;  %v1728_v53 = vld [vmem:[%s2118_s2 + $0xd8] sm:$0xff]  ;;  %v1725_v54 = vld [vmem:[%s2118_s2 + $0xc0] sm:$0xff]  ;;  %v1727_v55 = vld [vmem:[%s2118_s2 + $0xd0] sm:$0xff] }
  0x8a   :  { %v813_v18 = vmax.f32 %v1737_v12, %v810_v57  ;;  %v832_v19 = vmax.f32 %v1738_v10, %v810_v57  ;;  %v870_v20 = vmax.f32 %v1740_v11, %v810_v57  ;;  %v851_v23 = vmax.f32 %v1739_v13, %v810_v57 }
  0x8b   :  { %1416 = vmatprep.subr.mxu0 %v1008_v63  ;;  %1505 = vmatprep.subr.mxu1 %v1046_v0 }
  0x8c   :  { %v891_v7 = vpop.permute.xlu0 %890  ;;  %1417 = vmatpush1.msra.mxu0 %v989_v1  ;;  %1506 = vmatpush1.msra.mxu1 %v1027_v2  ;;  %v1722_v2 = vld [vmem:[%s2118_s2 + $0xa8] sm:$0xff] }
  0x8d   :  { %v724_v8 = vpop.permute.xlu1 %723  ;;  %v922_v14 = vmax.f32 %v918_v5, %v891_v7  ;;  %v960_v15 = vmax.f32 %v956_v6, %v891_v7  ;;  %v903_v16 = vmax.f32 %v899_v4, %v891_v7  ;;  %v941_v17 = vmax.f32 %v937_v9, %v891_v7  ;;  %v1724_v4 = vld [vmem:[%s2118_s2 + $0xb8] sm:$0xff]  ;;  %v1721_v5 = vld [vmem:[%s2118_s2 + $0xa0] sm:$0xff]  ;;  %v1723_v6 = vld [vmem:[%s2118_s2 + $0xb0] sm:$0xff] }
  0x8e   :  { %v727_v32 = vmax.f32 %v1733_v26, %v724_v8  ;;  %v746_v33 = vmax.f32 %v1734_v24, %v724_v8  ;;  %v784_v34 = vmax.f32 %v1736_v25, %v724_v8  ;;  %v765_v37 = vmax.f32 %v1735_v27, %v724_v8 }
  0x8f   :  { %1418 = vmatprep.subr.mxu0 %v922_v14  ;;  %1507 = vmatprep.subr.mxu1 %v960_v15 }
  0x90   :  { %v805_v21 = vpop.permute.xlu0 %804  ;;  %1419 = vmatpush1.msra.mxu0 %v903_v16  ;;  %1508 = vmatpush1.msra.mxu1 %v941_v17  ;;  %v1718_v17 = vld [vmem:[%s2118_s2 + $0x88] sm:$0xff] }
  0x91   :  { %v638_v22 = vpop.permute.xlu1 %637  ;;  %v836_v28 = vmax.f32 %v832_v19, %v805_v21  ;;  %v874_v29 = vmax.f32 %v870_v20, %v805_v21  ;;  %v817_v30 = vmax.f32 %v813_v18, %v805_v21  ;;  %v855_v31 = vmax.f32 %v851_v23, %v805_v21  ;;  %v1720_v18 = vld [vmem:[%s2118_s2 + $0x98] sm:$0xff]  ;;  %v1717_v19 = vld [vmem:[%s2118_s2 + $0x80] sm:$0xff]  ;;  %v1719_v20 = vld [vmem:[%s2118_s2 + $0x90] sm:$0xff] }
  0x92   :  { %v641_v46 = vmax.f32 %v1729_v40, %v638_v22  ;;  %v660_v47 = vmax.f32 %v1730_v38, %v638_v22  ;;  %v698_v48 = vmax.f32 %v1732_v39, %v638_v22  ;;  %v679_v51 = vmax.f32 %v1731_v41, %v638_v22  ;;  %v1709_v41 = vld [vmem:[%s2118_s2 + $0x40] sm:$0xff] }
  0x93   :  { %1420 = vmatprep.subr.mxu0 %v836_v28  ;;  %1509 = vmatprep.subr.mxu1 %v874_v29  ;;  %v1714_v28 = vld [vmem:[%s2118_s2 + $0x68] sm:$0xff]  ;;  %v1716_v29 = vld [vmem:[%s2118_s2 + $0x78] sm:$0xff] }
  0x94   :  { %v719_v35 = vpop.permute.xlu0 %718  ;;  %1421 = vmatpush1.msra.mxu0 %v817_v30  ;;  %1510 = vmatpush1.msra.mxu1 %v855_v31  ;;  %v1713_v30 = vld [vmem:[%s2118_s2 + $0x60] sm:$0xff] }
  0x95   :  { %v552_v36 = vpop.permute.xlu1 %551  ;;  %v750_v42 = vmax.f32 %v746_v33, %v719_v35  ;;  %v788_v43 = vmax.f32 %v784_v34, %v719_v35  ;;  %v731_v44 = vmax.f32 %v727_v32, %v719_v35  ;;  %v769_v45 = vmax.f32 %v765_v37, %v719_v35  ;;  %v1715_v34 = vld [vmem:[%s2118_s2 + $0x70] sm:$0xff] }
  0x96   :  { %v555_v60 = vmax.f32 %v1725_v54, %v552_v36  ;;  %v574_v61 = vmax.f32 %v1726_v52, %v552_v36  ;;  %v612_v62 = vmax.f32 %v1728_v53, %v552_v36  ;;  %v593_v1 = vmax.f32 %v1727_v55, %v552_v36 }
  0x97   :  { %1422 = vmatprep.subr.mxu0 %v750_v42  ;;  %1511 = vmatprep.subr.mxu1 %v788_v43 }
  0x98   :  { %v633_v49 = vpop.permute.xlu0 %632  ;;  %1423 = vmatpush1.msra.mxu0 %v731_v44  ;;  %1512 = vmatpush1.msra.mxu1 %v769_v45  ;;  %v1710_v44 = vld [vmem:[%s2118_s2 + $0x48] sm:$0xff]  ;;  %v1711_v45 = vld [vmem:[%s2118_s2 + $0x50] sm:$0xff] }
  0x99   :  { %v466_v50 = vpop.permute.xlu1 %465  ;;  %v664_v56 = vmax.f32 %v660_v47, %v633_v49  ;;  %v702_v57 = vmax.f32 %v698_v48, %v633_v49  ;;  %v645_v58 = vmax.f32 %v641_v46, %v633_v49  ;;  %v683_v59 = vmax.f32 %v679_v51, %v633_v49  ;;  %v1712_v46 = vld [vmem:[%s2118_s2 + $0x58] sm:$0xff] }
  0x9a   :  { %v469_v11 = vmax.f32 %v1721_v5, %v466_v50  ;;  %v488_v12 = vmax.f32 %v1722_v2, %v466_v50  ;;  %v526_v13 = vmax.f32 %v1724_v4, %v466_v50  ;;  %v507_v16 = vmax.f32 %v1723_v6, %v466_v50  ;;  %v1703_v6 = vld [vmem:[%s2118_s2 + $0x10] sm:$0xff] }
  0x9b   :  { %1424 = vmatprep.subr.mxu0 %v664_v56  ;;  %1513 = vmatprep.subr.mxu1 %v702_v57  ;;  %v1706_v57 = vld [vmem:[%s2118_s2 + $0x28] sm:$0xff] }
  0x9c   :  { %v547_v63 = vpop.permute.xlu0 %546  ;;  %1425 = vmatpush1.msra.mxu0 %v645_v58  ;;  %1514 = vmatpush1.msra.mxu1 %v683_v59  ;;  %v1707_v58 = vld [vmem:[%s2118_s2 + $0x30] sm:$0xff]  ;;  %v1708_v59 = vld [vmem:[%s2118_s2 + $0x38] sm:$0xff] }
  0x9d   :  { %v380_v0 = vpop.permute.xlu1 %379  ;;  %v578_v7 = vmax.f32 %v574_v61, %v547_v63  ;;  %v616_v8 = vmax.f32 %v612_v62, %v547_v63  ;;  %v559_v9 = vmax.f32 %v555_v60, %v547_v63  ;;  %v597_v10 = vmax.f32 %v593_v1, %v547_v63  ;;  %v1705_v62 = vld [vmem:[%s2118_s2 + $0x20] sm:$0xff]  ;;  %v1702_v63 = vld [vmem:[%s2118_s2 + $0x8] sm:$0xff] }
  0x9e   :  { %v383_v25 = vmax.f32 %v1717_v19, %v380_v0  ;;  %v402_v26 = vmax.f32 %v1718_v17, %v380_v0  ;;  %v440_v27 = vmax.f32 %v1720_v18, %v380_v0  ;;  %v421_v33 = vmax.f32 %v1719_v20, %v380_v0  ;;  %v1704_v0 = vld [vmem:[%s2118_s2 + $0x18] sm:$0xff] }
  0x9f   :  { %1426 = vmatprep.subr.mxu0 %v578_v7  ;;  %1515 = vmatprep.subr.mxu1 %v616_v8  ;;  %v24_v7 = vld [vmem:[%s2118_s2] sm:$0xff] }
  0xa0   :  { %v461_v14 = vpop.permute.xlu0 %460  ;;  %1427 = vmatpush1.msra.mxu0 %v559_v9  ;;  %1516 = vmatpush1.msra.mxu1 %v597_v10 }
  0xa1   :  { %v294_v15 = vpop.permute.xlu1 %293  ;;  %v492_v21 = vmax.f32 %v488_v12, %v461_v14  ;;  %v530_v22 = vmax.f32 %v526_v13, %v461_v14  ;;  %v473_v23 = vmax.f32 %v469_v11, %v461_v14  ;;  %v511_v24 = vmax.f32 %v507_v16, %v461_v14 }
  0xa2   :  { %v297_v38 = vmax.f32 %v1713_v30, %v294_v15  ;;  %v316_v39 = vmax.f32 %v1714_v28, %v294_v15  ;;  %v354_v40 = vmax.f32 %v1716_v29, %v294_v15  ;;  %v335_v43 = vmax.f32 %v1715_v34, %v294_v15  ;;  %v1342_v28 = vld [vmem:[%s2116_s0 + $0x10] sm:$0xff]  ;;  %v1343_v29 = vld [vmem:[%s2116_s0 + $0x18] sm:$0xff] }
  0xa3   :  { %1428 = vmatprep.subr.mxu0 %v492_v21  ;;  %1517 = vmatprep.subr.mxu1 %v530_v22 }
  0xa4   :  { %v375_v31 = vpop.permute.xlu0 %374  ;;  %1429 = vmatpush1.msra.mxu0 %v473_v23  ;;  %1518 = vmatpush1.msra.mxu1 %v511_v24 }
  0xa5   :  { %v208_v32 = vpop.permute.xlu1 %207  ;;  %v406_v35 = vmax.f32 %v402_v26, %v375_v31  ;;  %v444_v36 = vmax.f32 %v440_v27, %v375_v31  ;;  %v387_v37 = vmax.f32 %v383_v25, %v375_v31  ;;  %v425_v42 = vmax.f32 %v421_v33, %v375_v31  ;;  %v1340_v26 = vld [vmem:[%s2116_s0] sm:$0xff]  ;;  %v1341_v27 = vld [vmem:[%s2116_s0 + $0x8] sm:$0xff] }
  0xa6   :  { %v211_v52 = vmax.f32 %v1709_v41, %v208_v32  ;;  %v230_v54 = vmax.f32 %v1710_v44, %v208_v32  ;;  %v249_v55 = vmax.f32 %v1711_v45, %v208_v32  ;;  %v268_v56 = vmax.f32 %v1712_v46, %v208_v32 }
  0xa7   :  { %1430 = vmatprep.subr.mxu0 %v406_v35  ;;  %1519 = vmatprep.subr.mxu1 %v444_v36 }
  0xa8   :  { %v289_v47 = vpop.permute.xlu0 %288  ;;  %1431 = vmatpush1.msra.mxu0 %v387_v37  ;;  %1520 = vmatpush1.msra.mxu1 %v425_v42 }
  0xa9   :  { %v122_v48 = vpop.permute.xlu1 %121  ;;  %v320_v49 = vmax.f32 %v316_v39, %v289_v47  ;;  %v358_v50 = vmax.f32 %v354_v40, %v289_v47  ;;  %v301_v51 = vmax.f32 %v297_v38, %v289_v47  ;;  %v339_v53 = vmax.f32 %v335_v43, %v289_v47 }
  0xaa   :  { %v144_v8 = vmax.f32 %v1706_v57, %v122_v48  ;;  %v163_v9 = vmax.f32 %v1707_v58, %v122_v48  ;;  %v182_v10 = vmax.f32 %v1708_v59, %v122_v48  ;;  %v125_v11 = vmax.f32 %v1705_v62, %v122_v48 }
  0xab   :  { %1432 = vmatprep.subr.mxu0 %v320_v49  ;;  %1521 = vmatprep.subr.mxu1 %v358_v50 }
  0xac   :  { %1433 = vmatpush1.msra.mxu0 %v301_v51  ;;  %1522 = vmatpush1.msra.mxu1 %v339_v53  ;;  %v203_v60 = vpop.permute.xlu0 %202 }
  0xad   :  { %v37_v61 = vpop.permute.xlu1 %36  ;;  %v234_v1 = vmax.f32 %v230_v54, %v203_v60  ;;  %v272_v2 = vmax.f32 %v268_v56, %v203_v60  ;;  %v215_v4 = vmax.f32 %v211_v52, %v203_v60  ;;  %v253_v5 = vmax.f32 %v249_v55, %v203_v60 }
  0xae   :  { %v58_v12 = vmax.f32 %v1702_v63, %v37_v61  ;;  %v96_v13 = vmax.f32 %v1704_v0, %v37_v61  ;;  %v77_v15 = vmax.f32 %v1703_v6, %v37_v61  ;;  %v40_v17 = vmax.f32 %v24_v7, %v37_v61 }
  0xaf   :  { %1434 = vmatprep.subr.mxu0 %v234_v1  ;;  %1523 = vmatprep.subr.mxu1 %v272_v2 }
  0xb0   :  { %1435 = vmatpush1.msra.mxu0 %v215_v4  ;;  %1524 = vmatpush1.msra.mxu1 %v253_v5  ;;  %v117_v14 = vpop.permute.xlu0 %116 }
  0xb1   :  { %v33_v16 = vpop.permute.xlu1 %32  ;;  %v129_v18 = vmax.f32 %v125_v11, %v117_v14  ;;  %v148_v19 = vmax.f32 %v144_v8, %v117_v14  ;;  %v167_v20 = vmax.f32 %v163_v9, %v117_v14  ;;  %v186_v21 = vmax.f32 %v182_v10, %v117_v14 }
  0xb2   :  { %v62_v22 = vmax.f32 %v58_v12, %v33_v16  ;;  %v100_v23 = vmax.f32 %v96_v13, %v33_v16  ;;  %v44_v24 = vmax.f32 %v40_v17, %v33_v16  ;;  %v81_v25 = vmax.f32 %v77_v15, %v33_v16 }
  0xb3   :  { %1436 = vmatprep.subr.mxu0 %v148_v19  ;;  %1525 = vmatprep.subr.mxu1 %v186_v21 }
  0xb4   :  { %1437 = vmatpush1.msra.mxu0 %v129_v18  ;;  %1526 = vmatpush1.msra.mxu1 %v167_v20 }
  0xb5   :  { %1438 = vmatprep.subr.mxu0 %v62_v22  ;;  %1527 = vmatprep.subr.mxu1 %v100_v23  ;;  %v1662_v23 = vld [vmem:[%s2117_s1] sm:$0xff] }
  0xb6   :  { %1439 = vmatpush1.msra.mxu0 %v44_v24  ;;  %1528 = vmatpush1.msra.mxu1 %v81_v25 }
  0xb7   :  { %1473 = vmatmul.mubr.f32.vlgmr.msra.gmra.mxu0 %v1340_v26  ;;  %1562 = vmatmul.mubr.f32.vlgmr.msra.gmra.mxu1 %v1340_v26  ;;  %v1664_v26 = vld [vmem:[%s2117_s1 + $0x10] sm:$0xff] }
  0xb8   :  { %1478 = vmatprep.mubr.f32.mxu0 %v1834_v3  ;;  %1567 = vmatprep.mubr.f32.mxu1 %v1834_v3 }
  0xbb   :  { %1479 = vmatmul.mubr.f32.gmra.mxu0 %v1341_v27  ;;  %1568 = vmatmul.mubr.f32.gmra.mxu1 %v1341_v27 }
  0xbc   :  { %1484 = vmatprep.mubr.f32.mxu0 %v1834_v3  ;;  %1573 = vmatprep.mubr.f32.mxu1 %v1834_v3 }
  0xbf   :  { %1485 = vmatmul.mubr.f32.gmra.mxu0 %v1342_v28  ;;  %1574 = vmatmul.mubr.f32.gmra.mxu1 %v1342_v28 }
  0xc0   :  { %1490 = vmatprep.mubr.f32.mxu0 %v1834_v3  ;;  %1579 = vmatprep.mubr.f32.mxu1 %v1834_v3 }
  0xc3   :  { %1491 = vmatmul.mubr.f32.gmra.mxu0 %v1343_v29  ;;  %1580 = vmatmul.mubr.f32.gmra.mxu1 %v1343_v29  ;;  %v1663_v29 = vld [vmem:[%s2117_s1 + $0x8] sm:$0xff] }
 0x177   :  { %v1474_v30 = vpop.f32.mrf.mxu0  ;;  %v1563_v31 = vpop.f32.mrf.mxu1 }
 0x178   :  { %v1757_v32 = vmul.f32 -1.442695, %v1474_v30  ;;  %v1759_v33 = vmul.f32 -1.442695, %v1563_v31 }
 0x179   :  { %v1476_v34 = vpop.f32.mrf.mxu0  ;;  %v1565_v35 = vpop.f32.mrf.mxu1 }
 0x17a   :  { %1770 = vpow2.f32 %v1757_v32  ;;  %v1758_v36 = vmul.f32 -1.442695, %v1476_v34  ;;  %v1760_v37 = vmul.f32 -1.442695, %v1565_v35 }
 0x17b   :  { %1772 = vpow2.f32 %v1759_v33  ;;  %v1480_v38 = vpop.f32.mrf.mxu0  ;;  %v1569_v39 = vpop.f32.mrf.mxu1  ;;  %v1665_v33 = vld [vmem:[%s2117_s1 + $0x18] sm:$0xff] }
 0x17c   :  { %1774 = vpow2.f32 %v1758_v36  ;;  %v1761_v3 = vmul.f32 -1.442695, %v1480_v38  ;;  %v1763_v40 = vmul.f32 -1.442695, %v1569_v39 }
 0x17d   :  { %1776 = vpow2.f32 %v1760_v37  ;;  %v1482_v41 = vpop.f32.mrf.mxu0  ;;  %v1571_v42 = vpop.f32.mrf.mxu1 }
 0x17e   :  { %1778 = vpow2.f32 %v1761_v3  ;;  %v1762_v43 = vmul.f32 -1.442695, %v1482_v41  ;;  %v1764_v44 = vmul.f32 -1.442695, %v1571_v42 }
 0x17f   :  { %1780 = vpow2.f32 %v1763_v40  ;;  %v1486_v45 = vpop.f32.mrf.mxu0  ;;  %v1575_v46 = vpop.f32.mrf.mxu1 }
 0x180   :  { %1782 = vpow2.f32 %v1762_v43  ;;  %v1765_v47 = vmul.f32 -1.442695, %v1486_v45  ;;  %v1767_v48 = vmul.f32 -1.442695, %v1575_v46 }
 0x181   :  { %1784 = vpow2.f32 %v1764_v44  ;;  %v1488_v49 = vpop.f32.mrf.mxu0  ;;  %v1577_v50 = vpop.f32.mrf.mxu1 }
 0x182   :  { %1786 = vpow2.f32 %v1765_v47  ;;  %v1766_v51 = vmul.f32 -1.442695, %v1488_v49  ;;  %v1768_v52 = vmul.f32 -1.442695, %v1577_v50 }
 0x183   :  { %1788 = vpow2.f32 %v1767_v48  ;;  %v1492_v53 = vpop.f32.mrf.mxu0  ;;  %v1581_v54 = vpop.f32.mrf.mxu1 }
 0x184   :  { %1790 = vpow2.f32 %v1766_v51 }
 0x185   :  { %1792 = vpow2.f32 %v1768_v52  ;;  %v1494_v55 = vpop.f32.mrf.mxu0  ;;  %v1583_v56 = vpop.f32.mrf.mxu1 }
 0x186   :  { %1794 = vtanh.f32 %v1492_v53 }
 0x187   :  { %v1771_v57 = vpop.eup %1770  ;;  %1796 = vtanh.f32 %v1581_v54 }
 0x188   :  { %v1773_v58 = vpop.eup %1772  ;;  %v1598_v59 = vadd.f32 1.0, %v1771_v57  ;;  %1798 = vtanh.f32 %v1494_v55 }
 0x189   :  { %v1775_v60 = vpop.eup %1774  ;;  %v1600_v61 = vadd.f32 1.0, %v1773_v58  ;;  %1800 = vtanh.f32 %v1583_v56 }
 0x18a   :  { %v1777_v62 = vpop.eup %1776  ;;  %1802 = vrcp.f32 %v1598_v59  ;;  %v1599_v63 = vadd.f32 1.0, %v1775_v60 }
 0x18b   :  { %v1779_v0 = vpop.eup %1778  ;;  %1804 = vrcp.f32 %v1600_v61  ;;  %v1601_v1 = vadd.f32 1.0, %v1777_v62 }
 0x18c   :  { %v1781_v2 = vpop.eup %1780  ;;  %1806 = vrcp.f32 %v1599_v63  ;;  %v1622_v4 = vadd.f32 1.0, %v1779_v0 }
 0x18d   :  { %v1783_v5 = vpop.eup %1782  ;;  %1808 = vrcp.f32 %v1601_v1  ;;  %v1624_v6 = vadd.f32 1.0, %v1781_v2 }
 0x18e   :  { %v1785_v7 = vpop.eup %1784  ;;  %1810 = vrcp.f32 %v1622_v4  ;;  %v1623_v8 = vadd.f32 1.0, %v1783_v5 }
 0x18f   :  { %v1787_v9 = vpop.eup %1786  ;;  %1812 = vrcp.f32 %v1624_v6  ;;  %v1625_v10 = vadd.f32 1.0, %v1785_v7 }
 0x190   :  { %v1789_v11 = vpop.eup %1788  ;;  %1814 = vrcp.f32 %v1623_v8  ;;  %v1646_v20 = vadd.f32 1.0, %v1787_v9 }
 0x191   :  { %v1791_v12 = vpop.eup %1790  ;;  %1816 = vrcp.f32 %v1625_v10  ;;  %v1648_v22 = vadd.f32 1.0, %v1789_v11 }
 0x192   :  { %v1793_v13 = vpop.eup %1792  ;;  %v1647_v25 = vadd.f32 1.0, %v1791_v12  ;;  %1818 = vrcp.f32 %v1646_v20 }
 0x193   :  { %v1795_v14 = vpop.eup %1794  ;;  %v1649_v28 = vadd.f32 1.0, %v1793_v13  ;;  %1820 = vrcp.f32 %v1648_v22 }
 0x194   :  { %v1797_v15 = vpop.eup %1796  ;;  %1822 = vrcp.f32 %v1647_v25 }
 0x195   :  { %v1799_v16 = vpop.eup %1798  ;;  %1824 = vrcp.f32 %v1649_v28 }
 0x196   :  { %v1801_v17 = vpop.eup %1800 }
 0x197   :  { %v1803_v18 = vpop.eup %1802 }
 0x198   :  { %v1805_v19 = vpop.eup %1804  ;;  %v1670_v32 = vmul.f32 %v1803_v18, %v1795_v14 }
 0x199   :  { %v1807_v21 = vpop.eup %1806  ;;  %v1672_v36 = vmul.f32 %v1805_v19, %v1797_v15 }
 0x19a   :  { %v1809_v24 = vpop.eup %1808  ;;  %v1671_v3 = vmul.f32 %v1807_v21, %v1799_v16 }
 0x19b   :  { %v1811_v27 = vpop.eup %1810  ;;  %v1673_v42 = vmul.f32 %v1809_v24, %v1801_v17 }
 0x19c   :  { %v1813_v30 = vpop.eup %1812  ;;  %v1666_v31 = vmul.f32 %v1811_v27, %v1662_v23 }
 0x19d   :  { %v1815_v34 = vpop.eup %1814  ;;  %v1668_v35 = vmul.f32 %v1813_v30, %v1664_v26 }
 0x19e   :  { %v1817_v37 = vpop.eup %1816  ;;  %v1674_v38 = vadd.f32 %v1670_v32, %v1666_v31  ;;  %v1667_v39 = vmul.f32 %v1815_v34, %v1663_v29 }
 0x19f   :  { %v1676_v40 = vadd.f32 %v1672_v36, %v1668_v35  ;;  %v1669_v41 = vmul.f32 %v1817_v37, %v1665_v33  ;;  %v1819_v45 = vpop.eup %1818 }
 0x1a0   :  { %1826 = vtanh.f32 %v1674_v38  ;;  %1690 = vst [vmem:[%s2123_s7] sm:$0xff] %v1674_v38  ;;  %v1675_v43 = vadd.f32 %v1671_v3, %v1667_v39  ;;  %v1821_v46 = vpop.eup %1820 }
 0x1a1   :  { %1828 = vtanh.f32 %v1676_v40  ;;  %1692 = vst [vmem:[%s2123_s7 + $0x10] sm:$0xff] %v1676_v40  ;;  %v1677_v44 = vadd.f32 %v1673_v42, %v1669_v41  ;;  %v1823_v47 = vpop.eup %1822 }
 0x1a2   :  { %1830 = vtanh.f32 %v1675_v43  ;;  %1691 = vst [vmem:[%s2123_s7 + $0x8] sm:$0xff] %v1675_v43  ;;  %v1825_v48 = vpop.eup %1824 }
 0x1a3   :  { %1832 = vtanh.f32 %v1677_v44  ;;  %1693 = vst [vmem:[%s2123_s7 + $0x18] sm:$0xff] %v1677_v44 }
 0x1ad   :  { %v1827_v49 = vpop.eup %1826 }
 0x1ae   :  { %v1829_v50 = vpop.eup %1828  ;;  %v1682_v51 = vmul.f32 %v1827_v49, %v1819_v45 }
 0x1af   :  { %v1831_v52 = vpop.eup %1830  ;;  %v1684_v53 = vmul.f32 %v1829_v50, %v1821_v46 }
 0x1b0   :  { %v1833_v54 = vpop.eup %1832  ;;  %1686 = vst [vmem:[%s2122_s6] sm:$0xff] %v1682_v51  ;;  %v1683_v55 = vmul.f32 %v1831_v52, %v1823_v47 }
 0x1b1   :  { %1688 = vst [vmem:[%s2122_s6 + $0x10] sm:$0xff] %v1684_v53  ;;  %v1685_v56 = vmul.f32 %v1833_v54, %v1825_v48 }
 0x1b2   :  { %1687 = vst [vmem:[%s2122_s6 + $0x8] sm:$0xff] %v1683_v55 }
 0x1b3   :  { %1689 = vst [vmem:[%s2122_s6 + $0x18] sm:$0xff] %v1685_v56 }

</bundles_post_ra>
